<compile_context>
chip_gen: v6e
topology: v6e:2x2x1
jax: 0.10.0
libtpu: 0.0.40
codegen_flags: <defaults>
</compile_context>

<pallas_src>
import functools

import jax
import jax.numpy as jnp
from jax.experimental import pallas as pl
from jax.experimental.pallas import tpu as pltpu


def _round_up(a, b):
    return (a + b - 1) // b * b


def _cdiv(a, b):
    return -(-a // b)


def _rel_ce_kernel(x_ref, y_ref, out_ref,
                   s_wnll, s_w, s_corr, s_ecorr, s_ecnt,
                   *, w0, w1, w2):
    # Grid: (chunk, step).  Chunk axis is "parallel" (megacore split on v7x),
    # step axis is the "arbitrary" reduction over the sample columns.
    k = pl.program_id(1)

    @pl.when(k == 0)
    def _():
        s_wnll[...] = jnp.zeros_like(s_wnll)
        s_w[...] = jnp.zeros_like(s_w)
        s_corr[...] = jnp.zeros_like(s_corr)
        s_ecorr[...] = jnp.zeros_like(s_ecorr)
        s_ecnt[...] = jnp.zeros_like(s_ecnt)

    # Sublane/lane-dense tiles: classes on the leading (size-3) axis,
    # samples fill full (8, tc) vreg planes.
    l0 = x_ref[0]                 # (8, tc) logits of class 0
    l1 = x_ref[1]
    l2 = x_ref[2]
    y = y_ref[...]                # (8, tc) int32 labels; padded entries are 3

    # log-sum-exp over 3 classes with only 2 exps + 1 log per sample
    # (exp(max - max) == 1); exact 3-way median keeps it stable.
    mx = jnp.maximum(jnp.maximum(l0, l1), l2)
    mn = jnp.minimum(jnp.minimum(l0, l1), l2)
    md = jnp.maximum(jnp.minimum(l0, l1), jnp.minimum(jnp.maximum(l0, l1), l2))
    lse = mx + jnp.log(1.0 + jnp.exp(md - mx) + jnp.exp(mn - mx))

    is0 = y == 0
    is1 = y == 1
    is2 = y == 2
    logit_y = jnp.where(is0, l0, jnp.where(is1, l1, l2))
    # Sentinel label 3 (padding) gets weight 0 -> contributes nothing, no NaN
    # (padded logits are 0 so nll = log(3) is finite and 0 * finite = 0).
    w_y = jnp.where(is0, w0, jnp.where(is1, w1, jnp.where(is2, w2, 0.0)))
    nll = lse - logit_y

    # First-occurrence argmax over the 3 classes (torch.argmax tie-break).
    c0 = jnp.logical_and(l0 >= l1, l0 >= l2)
    c1 = jnp.logical_and(jnp.logical_not(c0), l1 >= l2)
    am = jnp.where(c0, 0, jnp.where(c1, 1, 2))
    correct = (am == y).astype(jnp.float32)       # padding: am in {0,1,2}, y==3 -> 0
    edge = jnp.logical_or(is1, is2).astype(jnp.float32)  # padding (y==3) -> 0

    # Lane/sublane-wide elementwise accumulation (pure VPU); the only
    # cross-lane reductions happen once per chunk in the epilogue.
    s_wnll[...] += w_y * nll
    s_w[...] += w_y
    s_corr[...] += correct
    s_ecorr[...] += correct * edge
    s_ecnt[...] += edge

    # Epilogue: one XLU reduction per metric, write this chunk's partial sums
    # into rows 0..4 of a lane-dense (8, 128) output slab.
    @pl.when(k == pl.num_programs(1) - 1)
    def _():
        out_ref[...] = jnp.zeros_like(out_ref)

        def put(row, ref):
            total = jnp.sum(ref[...])
            out_ref[0, row:row + 1, :] = jnp.full((1, 128), total, jnp.float32)

        put(0, s_wnll)
        put(1, s_w)
        put(2, s_corr)
        put(3, s_ecorr)
        put(4, s_ecnt)


def rel_ce_loss(x, y, reweight=(0.1, 1.0, 1.0), tn_max=131072):
    """x: (N, 3) float logits, y: (N,) int labels.  Returns dict of scalars."""
    N, C = x.shape
    assert C == 3, "RelCELoss kernel is specialized for 3 relation classes"
    w0, w1, w2 = (float(v) for v in reweight)

    # Tile/grid selection: samples per tile TN = 8 * tc (tc lanes, multiple of
    # 128 -> TN multiple of 1024).  Large lane-dense tiles amortize per-step
    # overhead; a 2-way "parallel" chunk axis lets v7x use both TensorCores.
    tn = _round_up(min(tn_max, _round_up(N, 1024)), 1024)
    tc = tn // 8
    steps = _cdiv(N, tn)
    num_chunks = 2 if steps >= 2 else 1
    steps_per_chunk = _cdiv(steps, num_chunks)
    ncols_pad = num_chunks * steps_per_chunk * tc
    n_pad = 8 * ncols_pad

    # Sublane/lane-dense layout: (3, 8, Npad/8) logits, (8, Npad/8) labels.
    # Padded logits are 0 (finite), padded labels are sentinel 3 (weight 0).
    # TODO(synk): upstream producers should emit logits already transposed as
    # (3, N) / (3, 8, N/8) so this relayout copy through HBM disappears.
    xt = jnp.pad(x.astype(jnp.float32).T,
                 ((0, 0), (0, n_pad - N))).reshape(3, 8, ncols_pad)
    y2 = jnp.pad(y.astype(jnp.int32), (0, n_pad - N),
                 constant_values=3).reshape(8, ncols_pad)
    # TODO(synk): labels could be shipped as int8 (mind the (32,128) tiling)
    # to trim ~19% HBM traffic on v5e; kept int32 for lowering robustness.

    kernel = functools.partial(_rel_ce_kernel, w0=w0, w1=w1, w2=w2)

    cost = pl.CostEstimate(flops=40 * N, transcendentals=3 * N,
                           bytes_accessed=16 * N)

    # TODO(synk): on v7x, verify the chunk axis actually lands on both
    # TensorCores; if not, switch it to pltpu.CORE_PARALLEL.
    partial_sums = pl.pallas_call(
        kernel,
        out_shape=jax.ShapeDtypeStruct((num_chunks, 8, 128), jnp.float32),
        grid_spec=pltpu.PrefetchScalarGridSpec(
            num_scalar_prefetch=0,
            grid=(num_chunks, steps_per_chunk),
            in_specs=[
                pl.BlockSpec((3, 8, tc),
                             lambda c, k: (0, 0, c * steps_per_chunk + k)),
                pl.BlockSpec((8, tc),
                             lambda c, k: (0, c * steps_per_chunk + k)),
            ],
            out_specs=pl.BlockSpec((1, 8, 128), lambda c, k: (c, 0, 0)),
            scratch_shapes=[pltpu.VMEM((8, tc), jnp.float32)] * 5,
        ),
        compiler_params=pltpu.CompilerParams(
            dimension_semantics=("parallel", "arbitrary"),
            vmem_limit_bytes=32 * 1024 * 1024),
        cost_estimate=cost,
    )(xt, y2)

    # Tiny final combine in plain JAX (sum the per-chunk partials, then divide).
    sums = jnp.sum(partial_sums[:, :5, 0], axis=0)   # (5,)
    wnll, wsum, corr, ecorr, ecnt = (sums[i] for i in range(5))
    loss = wnll / wsum                               # weighted-mean NLL
    acc = corr / jnp.float32(N)                      # accuracy over all samples
    rec = jnp.where(ecnt > 0.0, ecorr / ecnt, jnp.float32(0.0))  # nan_to_num(.., 0)

    # TODO(synk): PyTorch returns float64 for the two accuracy metrics
    # (dtype=float); the TPU kernel keeps everything in float32.
    return {'graph_bce_loss': loss, 'rel_acc': acc, 'edge_recall': rec}


def _reference(x, y, reweight=(0.1, 1.0, 1.0)):
    """Pure-JAX reference mirroring the PyTorch module."""
    w = jnp.asarray(reweight, jnp.float32)
    logp = jax.nn.log_softmax(x.astype(jnp.float32), axis=1)
    nll = -jnp.take_along_axis(logp, y[:, None], axis=1)[:, 0]
    wy = w[y]
    loss = jnp.sum(wy * nll) / jnp.sum(wy)
    preds = (jnp.argmax(x, axis=1) == y).astype(jnp.float32)
    train_acc = jnp.mean(preds)
    edge_mask = (y > 0).astype(jnp.float32)
    denom = jnp.sum(edge_mask)
    edge_recall = jnp.where(denom > 0, jnp.sum(preds * edge_mask) / denom, 0.0)
    return loss, train_acc, edge_recall


if __name__ == "__main__":
    key = jax.random.PRNGKey(0)
    kx, ky = jax.random.split(key)

    # Case 1: small N (not a multiple of 1024) -> exercises the sentinel-label
    # padding path with a single tile.
    N1 = 300
    x1 = jax.random.normal(kx, (N1, 3), dtype=jnp.float32)
    y1 = jax.random.randint(ky, (N1,), 0, 3, dtype=jnp.int32)
    ref_loss1, ref_acc1, ref_rec1 = _reference(x1, y1)
    out1 = rel_ce_loss(x1, y1)
    jax.block_until_ready(out1)
    assert jnp.allclose(out1['graph_bce_loss'], ref_loss1, atol=1e-5, rtol=1e-5)
    assert jnp.allclose(out1['rel_acc'], ref_acc1, atol=1e-6)
    assert jnp.allclose(out1['edge_recall'], ref_rec1, atol=1e-6)

    # Case 2: larger N with small tiles -> multiple reduction steps, 2 parallel
    # chunks, and padding that spans more than one sublane row.
    kx2, ky2 = jax.random.split(jax.random.PRNGKey(0), 2)
    N2 = 5000
    x2 = jax.random.normal(kx2, (N2, 3), dtype=jnp.float32)
    y2 = jax.random.randint(ky2, (N2,), 0, 3, dtype=jnp.int32)
    ref_loss2, ref_acc2, ref_rec2 = _reference(x2, y2)
    out2 = rel_ce_loss(x2, y2, tn_max=2048)
    jax.block_until_ready(out2)
    assert jnp.allclose(out2['graph_bce_loss'], ref_loss2, atol=1e-5, rtol=1e-5)
    assert jnp.allclose(out2['rel_acc'], ref_acc2, atol=1e-6)
    assert jnp.allclose(out2['edge_recall'], ref_rec2, atol=1e-6)

    print("KERNEL_OK")
</pallas_src>

<mosaic_0001>
module attributes {stable_mosaic.version = 11 : i64} {
  func.func @_rel_ce_kernel(%arg0: i32, %arg1: i32, %arg2: memref<3x8x128xf32, #tpu.memory_space<vmem>>, %arg3: memref<8x128xi32, #tpu.memory_space<vmem>>, %arg4: memref<1x8x128xf32, #tpu.memory_space<vmem>>, %arg5: memref<8x128xf32, #tpu.memory_space<vmem>>, %arg6: memref<8x128xf32, #tpu.memory_space<vmem>>, %arg7: memref<8x128xf32, #tpu.memory_space<vmem>>, %arg8: memref<8x128xf32, #tpu.memory_space<vmem>>, %arg9: memref<8x128xf32, #tpu.memory_space<vmem>>) attributes {dimension_semantics = [#tpu.dimension_semantics<parallel>, #tpu.dimension_semantics<arbitrary>], iteration_bounds = array<i64: 1, 1>, scalar_prefetch = 0 : i64, scratch_operands = 5 : i64, tpu.core_type = #tpu.core_type<tc>, window_params = [{transform_indices = @transform_0, window_bounds = array<i64: 3, 8, 128>}, {transform_indices = @transform_1, window_bounds = array<i64: 8, 128>}, {transform_indices = @transform_2, window_bounds = array<i64: 1, 8, 128>}]} {
    %c0_i32 = arith.constant 0 : i32
    %0 = arith.cmpi eq, %arg1, %c0_i32 : i32
    %1 = arith.extui %0 : i1 to i32
    %c0_i32_0 = arith.constant 0 : i32
    %2 = arith.cmpi ne, %1, %c0_i32_0 : i32
    scf.if %2 {
      %cst_40 = arith.constant 0.000000e+00 : f32
      %80 = vector.broadcast %cst_40 : f32 to vector<8x128xf32>
      %c0_41 = arith.constant 0 : index
      %c0_42 = arith.constant 0 : index
      %81 = vector.load %arg5[%c0_41, %c0_42] : memref<8x128xf32, #tpu.memory_space<vmem>>, vector<8x128xf32>
      tpu.vector_store %arg5[%c0_41, %c0_42], %80 {strides = array<i32>} : memref<8x128xf32, #tpu.memory_space<vmem>>, vector<8x128xf32>,
      %cst_43 = arith.constant 0.000000e+00 : f32
      %82 = vector.broadcast %cst_43 : f32 to vector<8x128xf32>
      %c0_44 = arith.constant 0 : index
      %c0_45 = arith.constant 0 : index
      %83 = vector.load %arg6[%c0_44, %c0_45] : memref<8x128xf32, #tpu.memory_space<vmem>>, vector<8x128xf32>
      tpu.vector_store %arg6[%c0_44, %c0_45], %82 {strides = array<i32>} : memref<8x128xf32, #tpu.memory_space<vmem>>, vector<8x128xf32>,
      %cst_46 = arith.constant 0.000000e+00 : f32
      %84 = vector.broadcast %cst_46 : f32 to vector<8x128xf32>
      %c0_47 = arith.constant 0 : index
      %c0_48 = arith.constant 0 : index
      %85 = vector.load %arg7[%c0_47, %c0_48] : memref<8x128xf32, #tpu.memory_space<vmem>>, vector<8x128xf32>
      tpu.vector_store %arg7[%c0_47, %c0_48], %84 {strides = array<i32>} : memref<8x128xf32, #tpu.memory_space<vmem>>, vector<8x128xf32>,
      %cst_49 = arith.constant 0.000000e+00 : f32
      %86 = vector.broadcast %cst_49 : f32 to vector<8x128xf32>
      %c0_50 = arith.constant 0 : index
      %c0_51 = arith.constant 0 : index
      %87 = vector.load %arg8[%c0_50, %c0_51] : memref<8x128xf32, #tpu.memory_space<vmem>>, vector<8x128xf32>
      tpu.vector_store %arg8[%c0_50, %c0_51], %86 {strides = array<i32>} : memref<8x128xf32, #tpu.memory_space<vmem>>, vector<8x128xf32>,
      %cst_52 = arith.constant 0.000000e+00 : f32
      %88 = vector.broadcast %cst_52 : f32 to vector<8x128xf32>
      %c0_53 = arith.constant 0 : index
      %c0_54 = arith.constant 0 : index
      %89 = vector.load %arg9[%c0_53, %c0_54] : memref<8x128xf32, #tpu.memory_space<vmem>>, vector<8x128xf32>
      tpu.vector_store %arg9[%c0_53, %c0_54], %88 {strides = array<i32>} : memref<8x128xf32, #tpu.memory_space<vmem>>, vector<8x128xf32>,
    } else {
    }
    %c0 = arith.constant 0 : index
    %c0_1 = arith.constant 0 : index
    %c0_2 = arith.constant 0 : index
    %3 = vector.load %arg2[%c0, %c0_1, %c0_2] : memref<3x8x128xf32, #tpu.memory_space<vmem>>, vector<1x8x128xf32>
    %4 = vector.shape_cast %3 : vector<1x8x128xf32> to vector<8x128xf32>
    %c1 = arith.constant 1 : index
    %c0_3 = arith.constant 0 : index
    %c0_4 = arith.constant 0 : index
    %5 = vector.load %arg2[%c1, %c0_3, %c0_4] : memref<3x8x128xf32, #tpu.memory_space<vmem>>, vector<1x8x128xf32>
    %6 = vector.shape_cast %5 : vector<1x8x128xf32> to vector<8x128xf32>
    %c2 = arith.constant 2 : index
    %c0_5 = arith.constant 0 : index
    %c0_6 = arith.constant 0 : index
    %7 = vector.load %arg2[%c2, %c0_5, %c0_6] : memref<3x8x128xf32, #tpu.memory_space<vmem>>, vector<1x8x128xf32>
    %8 = vector.shape_cast %7 : vector<1x8x128xf32> to vector<8x128xf32>
    %c0_7 = arith.constant 0 : index
    %c0_8 = arith.constant 0 : index
    %9 = vector.load %arg3[%c0_7, %c0_8] : memref<8x128xi32, #tpu.memory_space<vmem>>, vector<8x128xi32>
    %10 = arith.maximumf %4, %6 : vector<8x128xf32>
    %11 = arith.maximumf %10, %8 : vector<8x128xf32>
    %12 = arith.minimumf %4, %6 : vector<8x128xf32>
    %13 = arith.minimumf %12, %8 : vector<8x128xf32>
    %14 = arith.minimumf %4, %6 : vector<8x128xf32>
    %15 = arith.maximumf %4, %6 : vector<8x128xf32>
    %16 = arith.minimumf %15, %8 : vector<8x128xf32>
    %17 = arith.maximumf %14, %16 : vector<8x128xf32>
    %18 = arith.subf %17, %11 : vector<8x128xf32>
    %19 = math.exp %18 : vector<8x128xf32>
    %cst = arith.constant 1.000000e+00 : f32
    %20 = vector.broadcast %cst : f32 to vector<8x128xf32>
    %21 = arith.addf %20, %19 : vector<8x128xf32>
    %22 = arith.subf %13, %11 : vector<8x128xf32>
    %23 = math.exp %22 : vector<8x128xf32>
    %24 = arith.addf %21, %23 : vector<8x128xf32>
    %25 = math.log %24 : vector<8x128xf32>
    %26 = arith.addf %11, %25 : vector<8x128xf32>
    %c0_i32_9 = arith.constant 0 : i32
    %27 = vector.broadcast %c0_i32_9 : i32 to vector<8x128xi32>
    %28 = arith.cmpi eq, %9, %27 : vector<8x128xi32>
    %c1_i32 = arith.constant 1 : i32
    %29 = vector.broadcast %c1_i32 : i32 to vector<8x128xi32>
    %30 = arith.cmpi eq, %9, %29 : vector<8x128xi32>
    %c2_i32 = arith.constant 2 : i32
    %31 = vector.broadcast %c2_i32 : i32 to vector<8x128xi32>
    %32 = arith.cmpi eq, %9, %31 : vector<8x128xi32>
    %33 = arith.select %30, %6, %8 : vector<8x128xi1>, vector<8x128xf32>
    %34 = arith.select %28, %4, %33 : vector<8x128xi1>, vector<8x128xf32>
    %cst_10 = arith.constant 1.000000e+00 : f32
    %cst_11 = arith.constant 0.000000e+00 : f32
    %35 = vector.broadcast %cst_10 : f32 to vector<8x128xf32>
    %36 = vector.broadcast %cst_11 : f32 to vector<8x128xf32>
    %37 = arith.select %32, %35, %36 : vector<8x128xi1>, vector<8x128xf32>
    %cst_12 = arith.constant 1.000000e+00 : f32
    %38 = vector.broadcast %cst_12 : f32 to vector<8x128xf32>
    %39 = arith.select %30, %38, %37 : vector<8x128xi1>, vector<8x128xf32>
    %cst_13 = arith.constant 1.000000e-01 : f32
    %40 = vector.broadcast %cst_13 : f32 to vector<8x128xf32>
    %41 = arith.select %28, %40, %39 : vector<8x128xi1>, vector<8x128xf32>
    %42 = arith.subf %26, %34 : vector<8x128xf32>
    %43 = arith.cmpf oge, %4, %6 : vector<8x128xf32>
    %44 = arith.cmpf oge, %4, %8 : vector<8x128xf32>
    %45 = arith.andi %43, %44 : vector<8x128xi1>
    %cst_14 = arith.constant dense<true> : vector<8x128xi1>
    %46 = arith.xori %45, %cst_14 : vector<8x128xi1>
    %47 = arith.cmpf oge, %6, %8 : vector<8x128xf32>
    %48 = arith.andi %46, %47 : vector<8x128xi1>
    %c1_i32_15 = arith.constant 1 : i32
    %c2_i32_16 = arith.constant 2 : i32
    %49 = vector.broadcast %c1_i32_15 : i32 to vector<8x128xi32>
    %50 = vector.broadcast %c2_i32_16 : i32 to vector<8x128xi32>
    %51 = arith.select %48, %49, %50 : vector<8x128xi1>, vector<8x128xi32>
    %c0_i32_17 = arith.constant 0 : i32
    %52 = vector.broadcast %c0_i32_17 : i32 to vector<8x128xi32>
    %53 = arith.select %45, %52, %51 : vector<8x128xi1>, vector<8x128xi32>
    %54 = arith.cmpi eq, %53, %9 : vector<8x128xi32>
    %55 = arith.extui %54 : vector<8x128xi1> to vector<8x128xi32>
    %56 = arith.sitofp %55 : vector<8x128xi32> to vector<8x128xf32>
    %57 = arith.ori %30, %32 : vector<8x128xi1>
    %58 = arith.extui %57 : vector<8x128xi1> to vector<8x128xi32>
    %59 = arith.sitofp %58 : vector<8x128xi32> to vector<8x128xf32>
    %c0_18 = arith.constant 0 : index
    %c0_19 = arith.constant 0 : index
    %60 = vector.load %arg5[%c0_18, %c0_19] : memref<8x128xf32, #tpu.memory_space<vmem>>, vector<8x128xf32>
    %61 = arith.mulf %41, %42 : vector<8x128xf32>
    %62 = arith.addf %60, %61 : vector<8x128xf32>
    %c0_20 = arith.constant 0 : index
    %c0_21 = arith.constant 0 : index
    %63 = vector.load %arg5[%c0_20, %c0_21] : memref<8x128xf32, #tpu.memory_space<vmem>>, vector<8x128xf32>
    tpu.vector_store %arg5[%c0_20, %c0_21], %62 {strides = array<i32>} : memref<8x128xf32, #tpu.memory_space<vmem>>, vector<8x128xf32>,
    %c0_22 = arith.constant 0 : index
    %c0_23 = arith.constant 0 : index
    %64 = vector.load %arg6[%c0_22, %c0_23] : memref<8x128xf32, #tpu.memory_space<vmem>>, vector<8x128xf32>
    %65 = arith.addf %64, %41 : vector<8x128xf32>
    %c0_24 = arith.constant 0 : index
    %c0_25 = arith.constant 0 : index
    %66 = vector.load %arg6[%c0_24, %c0_25] : memref<8x128xf32, #tpu.memory_space<vmem>>, vector<8x128xf32>
    tpu.vector_store %arg6[%c0_24, %c0_25], %65 {strides = array<i32>} : memref<8x128xf32, #tpu.memory_space<vmem>>, vector<8x128xf32>,
    %c0_26 = arith.constant 0 : index
    %c0_27 = arith.constant 0 : index
    %67 = vector.load %arg7[%c0_26, %c0_27] : memref<8x128xf32, #tpu.memory_space<vmem>>, vector<8x128xf32>
    %68 = arith.addf %67, %56 : vector<8x128xf32>
    %c0_28 = arith.constant 0 : index
    %c0_29 = arith.constant 0 : index
    %69 = vector.load %arg7[%c0_28, %c0_29] : memref<8x128xf32, #tpu.memory_space<vmem>>, vector<8x128xf32>
    tpu.vector_store %arg7[%c0_28, %c0_29], %68 {strides = array<i32>} : memref<8x128xf32, #tpu.memory_space<vmem>>, vector<8x128xf32>,
    %c0_30 = arith.constant 0 : index
    %c0_31 = arith.constant 0 : index
    %70 = vector.load %arg8[%c0_30, %c0_31] : memref<8x128xf32, #tpu.memory_space<vmem>>, vector<8x128xf32>
    %71 = arith.mulf %56, %59 : vector<8x128xf32>
    %72 = arith.addf %70, %71 : vector<8x128xf32>
    %c0_32 = arith.constant 0 : index
    %c0_33 = arith.constant 0 : index
    %73 = vector.load %arg8[%c0_32, %c0_33] : memref<8x128xf32, #tpu.memory_space<vmem>>, vector<8x128xf32>
    tpu.vector_store %arg8[%c0_32, %c0_33], %72 {strides = array<i32>} : memref<8x128xf32, #tpu.memory_space<vmem>>, vector<8x128xf32>,
    %c0_34 = arith.constant 0 : index
    %c0_35 = arith.constant 0 : index
    %74 = vector.load %arg9[%c0_34, %c0_35] : memref<8x128xf32, #tpu.memory_space<vmem>>, vector<8x128xf32>
    %75 = arith.addf %74, %59 : vector<8x128xf32>
    %c0_36 = arith.constant 0 : index
    %c0_37 = arith.constant 0 : index
    %76 = vector.load %arg9[%c0_36, %c0_37] : memref<8x128xf32, #tpu.memory_space<vmem>>, vector<8x128xf32>
    tpu.vector_store %arg9[%c0_36, %c0_37], %75 {strides = array<i32>} : memref<8x128xf32, #tpu.memory_space<vmem>>, vector<8x128xf32>,
    %c0_i32_38 = arith.constant 0 : i32
    %77 = arith.cmpi eq, %arg1, %c0_i32_38 : i32
    %78 = arith.extui %77 : i1 to i32
    %c0_i32_39 = arith.constant 0 : i32
    %79 = arith.cmpi ne, %78, %c0_i32_39 : i32
    scf.if %79 {
      %cst_40 = arith.constant 0.000000e+00 : f32
      %80 = vector.broadcast %cst_40 : f32 to vector<1x8x128xf32>
      %c0_41 = arith.constant 0 : index
      %c0_42 = arith.constant 0 : index
      %c0_43 = arith.constant 0 : index
      %81 = vector.load %arg4[%c0_41, %c0_42, %c0_43] : memref<1x8x128xf32, #tpu.memory_space<vmem>>, vector<1x8x128xf32>
      tpu.vector_store %arg4[%c0_41, %c0_42, %c0_43], %80 {strides = array<i32>} : memref<1x8x128xf32, #tpu.memory_space<vmem>>, vector<1x8x128xf32>,
      %c0_44 = arith.constant 0 : index
      %c0_45 = arith.constant 0 : index
      %82 = vector.load %arg5[%c0_44, %c0_45] : memref<8x128xf32, #tpu.memory_space<vmem>>, vector<8x128xf32>
      %83 = vector.shape_cast %82 : vector<8x128xf32> to vector<1x8x128xf32>
      %cst_46 = arith.constant dense<0.000000e+00> : vector<1xf32>
      %84 = vector.multi_reduction <add>, %83, %cst_46 [1, 2] : vector<1x8x128xf32> to vector<1xf32>
      %85 = vector.shape_cast %84 : vector<1xf32> to vector<1x1x1xf32>
      %86 = vector.extract %85[0, 0, 0] : f32 from vector<1x1x1xf32>
      %87 = vector.broadcast %86 : f32 to vector<1x128xf32>
      %c0_47 = arith.constant 0 : index
      %c0_48 = arith.constant 0 : index
      %c0_49 = arith.constant 0 : index
      %88 = vector.load %arg4[%c0_47, %c0_48, %c0_49] : memref<1x8x128xf32, #tpu.memory_space<vmem>>, vector<1x1x128xf32>
      %89 = vector.shape_cast %88 : vector<1x1x128xf32> to vector<1x128xf32>
      %90 = vector.shape_cast %87 : vector<1x128xf32> to vector<1x1x128xf32>
      tpu.vector_store %arg4[%c0_47, %c0_48, %c0_49], %90 {strides = array<i32>} : memref<1x8x128xf32, #tpu.memory_space<vmem>>, vector<1x1x128xf32>,
      %c0_50 = arith.constant 0 : index
      %c0_51 = arith.constant 0 : index
      %91 = vector.load %arg6[%c0_50, %c0_51] : memref<8x128xf32, #tpu.memory_space<vmem>>, vector<8x128xf32>
      %92 = vector.shape_cast %91 : vector<8x128xf32> to vector<1x8x128xf32>
      %cst_52 = arith.constant dense<0.000000e+00> : vector<1xf32>
      %93 = vector.multi_reduction <add>, %92, %cst_52 [1, 2] : vector<1x8x128xf32> to vector<1xf32>
      %94 = vector.shape_cast %93 : vector<1xf32> to vector<1x1x1xf32>
      %95 = vector.extract %94[0, 0, 0] : f32 from vector<1x1x1xf32>
      %96 = vector.broadcast %95 : f32 to vector<1x128xf32>
      %c0_53 = arith.constant 0 : index
      %c1_54 = arith.constant 1 : index
      %c0_55 = arith.constant 0 : index
      %97 = vector.load %arg4[%c0_53, %c1_54, %c0_55] : memref<1x8x128xf32, #tpu.memory_space<vmem>>, vector<1x1x128xf32>
      %98 = vector.shape_cast %97 : vector<1x1x128xf32> to vector<1x128xf32>
      %99 = vector.shape_cast %96 : vector<1x128xf32> to vector<1x1x128xf32>
      tpu.vector_store %arg4[%c0_53, %c1_54, %c0_55], %99 {strides = array<i32>} : memref<1x8x128xf32, #tpu.memory_space<vmem>>, vector<1x1x128xf32>,
      %c0_56 = arith.constant 0 : index
      %c0_57 = arith.constant 0 : index
      %100 = vector.load %arg7[%c0_56, %c0_57] : memref<8x128xf32, #tpu.memory_space<vmem>>, vector<8x128xf32>
      %101 = vector.shape_cast %100 : vector<8x128xf32> to vector<1x8x128xf32>
      %cst_58 = arith.constant dense<0.000000e+00> : vector<1xf32>
      %102 = vector.multi_reduction <add>, %101, %cst_58 [1, 2] : vector<1x8x128xf32> to vector<1xf32>
      %103 = vector.shape_cast %102 : vector<1xf32> to vector<1x1x1xf32>
      %104 = vector.extract %103[0, 0, 0] : f32 from vector<1x1x1xf32>
      %105 = vector.broadcast %104 : f32 to vector<1x128xf32>
      %c0_59 = arith.constant 0 : index
      %c2_60 = arith.constant 2 : index
      %c0_61 = arith.constant 0 : index
      %106 = vector.load %arg4[%c0_59, %c2_60, %c0_61] : memref<1x8x128xf32, #tpu.memory_space<vmem>>, vector<1x1x128xf32>
      %107 = vector.shape_cast %106 : vector<1x1x128xf32> to vector<1x128xf32>
      %108 = vector.shape_cast %105 : vector<1x128xf32> to vector<1x1x128xf32>
      tpu.vector_store %arg4[%c0_59, %c2_60, %c0_61], %108 {strides = array<i32>} : memref<1x8x128xf32, #tpu.memory_space<vmem>>, vector<1x1x128xf32>,
      %c0_62 = arith.constant 0 : index
      %c0_63 = arith.constant 0 : index
      %109 = vector.load %arg8[%c0_62, %c0_63] : memref<8x128xf32, #tpu.memory_space<vmem>>, vector<8x128xf32>
      %110 = vector.shape_cast %109 : vector<8x128xf32> to vector<1x8x128xf32>
      %cst_64 = arith.constant dense<0.000000e+00> : vector<1xf32>
      %111 = vector.multi_reduction <add>, %110, %cst_64 [1, 2] : vector<1x8x128xf32> to vector<1xf32>
      %112 = vector.shape_cast %111 : vector<1xf32> to vector<1x1x1xf32>
      %113 = vector.extract %112[0, 0, 0] : f32 from vector<1x1x1xf32>
      %114 = vector.broadcast %113 : f32 to vector<1x128xf32>
      %c0_65 = arith.constant 0 : index
      %c3 = arith.constant 3 : index
      %c0_66 = arith.constant 0 : index
      %115 = vector.load %arg4[%c0_65, %c3, %c0_66] : memref<1x8x128xf32, #tpu.memory_space<vmem>>, vector<1x1x128xf32>
      %116 = vector.shape_cast %115 : vector<1x1x128xf32> to vector<1x128xf32>
      %117 = vector.shape_cast %114 : vector<1x128xf32> to vector<1x1x128xf32>
      tpu.vector_store %arg4[%c0_65, %c3, %c0_66], %117 {strides = array<i32>} : memref<1x8x128xf32, #tpu.memory_space<vmem>>, vector<1x1x128xf32>,
      %c0_67 = arith.constant 0 : index
      %c0_68 = arith.constant 0 : index
      %118 = vector.load %arg9[%c0_67, %c0_68] : memref<8x128xf32, #tpu.memory_space<vmem>>, vector<8x128xf32>
      %119 = vector.shape_cast %118 : vector<8x128xf32> to vector<1x8x128xf32>
      %cst_69 = arith.constant dense<0.000000e+00> : vector<1xf32>
      %120 = vector.multi_reduction <add>, %119, %cst_69 [1, 2] : vector<1x8x128xf32> to vector<1xf32>
      %121 = vector.shape_cast %120 : vector<1xf32> to vector<1x1x1xf32>
      %122 = vector.extract %121[0, 0, 0] : f32 from vector<1x1x1xf32>
      %123 = vector.broadcast %122 : f32 to vector<1x128xf32>
      %c0_70 = arith.constant 0 : index
      %c4 = arith.constant 4 : index
      %c0_71 = arith.constant 0 : index
      %124 = vector.load %arg4[%c0_70, %c4, %c0_71] : memref<1x8x128xf32, #tpu.memory_space<vmem>>, vector<1x1x128xf32>
      %125 = vector.shape_cast %124 : vector<1x1x128xf32> to vector<1x128xf32>
      %126 = vector.shape_cast %123 : vector<1x128xf32> to vector<1x1x128xf32>
      tpu.vector_store %arg4[%c0_70, %c4, %c0_71], %126 {strides = array<i32>} : memref<1x8x128xf32, #tpu.memory_space<vmem>>, vector<1x1x128xf32>,
    } else {
    }
    return
  }
  func.func @transform_0(%arg0: i32, %arg1: i32) -> (i32, i32, i32) {
    %c1_i32 = arith.constant 1 : i32
    %0 = arith.muli %arg0, %c1_i32 : i32
    %1 = arith.addi %0, %arg1 : i32
    %c0_i32 = arith.constant 0 : i32
    %c0_i32_0 = arith.constant 0 : i32
    %c0_i32_1 = arith.constant 0 : i32
    return %c0_i32, %c0_i32_0, %1 : i32, i32, i32
  }
  func.func @transform_1(%arg0: i32, %arg1: i32) -> (i32, i32) {
    %c1_i32 = arith.constant 1 : i32
    %0 = arith.muli %arg0, %c1_i32 : i32
    %1 = arith.addi %0, %arg1 : i32
    %c0_i32 = arith.constant 0 : i32
    %c0_i32_0 = arith.constant 0 : i32
    return %c0_i32, %1 : i32, i32
  }
  func.func @transform_2(%arg0: i32, %arg1: i32) -> (i32, i32, i32) {
    %c0_i32 = arith.constant 0 : i32
    %c0_i32_0 = arith.constant 0 : i32
    %c0_i32_1 = arith.constant 0 : i32
    return %arg0, %c0_i32, %c0_i32_0 : i32, i32, i32
  }
}

</mosaic_0001>

<bundles_post_ra>
// kernel: tpu_custom_call.1
= control target key start
LH: loop header
LB: loop body
LE: loop exit
PB: predicated region body
PF: predicated region fallthrough
CT: control target
= control target key end

     0   :  { %7 = vsyncpa [#allocation8], 0  ;;  %s333_s0 = inlined_call_operand.hbm [shape: f32[3,8,128], index: 0, kind: input, shape index: {}]   ;;  %s334_s1 = inlined_call_operand.hbm [shape: s32[8,128], index: 1, kind: input, shape index: {}]   ;;  %s335_s2 = inlined_call_operand.hbm [shape: f32[1,8,128], index: 2, kind: output, shape index: {}]  }
   0x1   :  { %8 = vsyncpa [#allocation11], 0 }
   0x2   :  { %9 = vsyncpa [#allocation9], 0  ;;  %s290_s9 = smov [#allocation7]  }
   0x3   :  { %s18_s10 = sshll.u32 %s290_s9, 4  ;;  %s19_s10 = int_to_ptr.vmem [resolvable:$true] %s18_s10 }
   0x4   :  { %s232_s11 = scalar_lea.vmem %s19_s10, 384  ;;  %p237_p1 = scmp.lt.s32.totalorder %s19_s10, %s19_s10 }
   0x5   :  { %p233_p0 = scmp.ne.s32.totalorder %s19_s10, %s232_s11  ;;  %p238_p2 = scmp.lt.s32.totalorder %s232_s11, %s232_s11 }
   0x7   :  { %p239_p3 = por %p238_p2, %p237_p1 }
   0x9   :  { %p240_p4 = pnand %p239_p3, %p233_p0 }
   0xb   :  { %243 = shalt.err (!%p240_p4)
}
   0xc   :  { %s291_s12 = smov 128   ;;  %s292_s13 = smov 8  }
   0xd   :  { %24 = dma.hbm_to_vmem [thread:$0]  %s333_s0, 384, %s19_s10, [#allocation8], %s291_s12, %s291_s12, %s292_s13  }
   0xe   :  { %s293_s16 = smov [#allocation10]  }
   0xf   :  { %s34_s17 = sshll.u32 %s293_s16, 4  ;;  %s35_s17 = int_to_ptr.vmem [resolvable:$true] %s34_s17 }
  0x10   :  { %s252_s18 = scalar_lea.vmem %s35_s17, 128  ;;  %p257_p6 = scmp.lt.s32.totalorder %s35_s17, %s35_s17 }
  0x11   :  { %p253_p5 = scmp.ne.s32.totalorder %s35_s17, %s252_s18  ;;  %p258_p7 = scmp.lt.s32.totalorder %s252_s18, %s252_s18 }
  0x13   :  { %p259_p8 = por %p258_p7, %p257_p6 }
  0x15   :  { %p260_p9 = pnand %p259_p8, %p253_p5 }
  0x17   :  { %263 = shalt.err (!%p260_p9)
}
  0x18   :  { %37 = dma.hbm_to_vmem [thread:$0]  %s334_s1, 128, %s35_s17, [#allocation11]  }
  0x19   :  { %284 = dma.done.wait [#allocation8], 384  }
  0x1a   :  { %285 = vsyncadd [#allocation8], 4294966912 }
  0x1b   :  { %286 = dma.done.wait [#allocation11], 128  }
  0x1c   :  { %287 = vsyncadd [#allocation11], 4294967168  ;;  %v294_v0 = vmov 0.0   ;;  %v60_v1 = vld [vmem:[#allocation10] sm:$0xff]  ;;  %v55_v2 = vld [vmem:[#allocation7] sm:$0xff]  ;;  %vm295_vm8 = vmmov 1  }
  0x1d   :  { %121 = vst [vmem:[#allocation12] sm:$0xff] %v294_v0  ;;  %vm78_vm0 = vcmp.eq.s32.totalorder %v60_v1, 0  ;;  %vm79_vm1 = vcmp.eq.s32.totalorder %v60_v1, 1  ;;  %vm80_vm2 = vcmp.eq.s32.totalorder %v60_v1, 2  ;;  %v57_v3 = vld [vmem:[#allocation7 + $0x8] sm:$0xff]  ;;  %v59_v4 = vld [vmem:[#allocation7 + $0x10] sm:$0xff] }
  0x1e   :  { %v83_v5 = vsel %vm80_vm2, 1.0, %v294_v0  ;;  %v63_v6 = vmin.f32 %v55_v2, %v57_v3  ;;  %vm87_vm3 = vcmp.ge.f32.partialorder %v55_v2, %v57_v3  ;;  %vm88_vm4 = vcmp.ge.f32.partialorder %v55_v2, %v59_v4  ;;  %vm320_vm5 = vmor %vm79_vm1, %vm80_vm2  ;;  %s297_s21 = smov [#allocation12]  }
  0x1f   :  { %v84_v8 = vsel %vm79_vm1, 1.0, %v83_v5  ;;  %vm89_vm6 = vmand %vm87_vm3, %vm88_vm4  ;;  %vm91_vm7 = vcmp.ge.f32.partialorder %v57_v3, %v59_v4  ;;  %v61_v10 = vmax.f32 %v55_v2, %v57_v3  ;;  %v296_v12 = vmov 2   ;;  %s188_s22 = sshll.u32 %s297_s21, 4  ;;  %s189_s22 = int_to_ptr.vmem [resolvable:$true] %s188_s22 }
  0x20   :  { %v85_v9 = vsel %vm78_vm0, 0.1, %v84_v8  ;;  %vm90_vm9 = vmxor %vm89_vm6, %vm295_vm8  ;;  %v64_v11 = vmin.f32 %v63_v6, %v59_v4  ;;  %v199_v17 = vsel %vm320_vm5, 1.0, %v294_v0  ;;  %v81_v29 = vsel %vm79_vm1, %v57_v3, %v59_v4  ;;  %s264_s26 = scalar_lea.vmem %s189_s22, 128  ;;  %p269_p11 = scmp.lt.s32.totalorder %s189_s22, %s189_s22 }
  0x21   :  { %135 = vadd.xlane.f32.xlu0 %v85_v9  ;;  %vm92_vm10 = vmand %vm90_vm9, %vm91_vm7  ;;  %v62_v14 = vmax.f32 %v61_v10, %v59_v4  ;;  %v65_v15 = vmin.f32 %v61_v10, %v59_v4  ;;  %v82_v32 = vsel %vm78_vm0, %v55_v2, %v81_v29  ;;  %p265_p10 = scmp.ne.s32.totalorder %s189_s22, %s264_s26  ;;  %p270_p12 = scmp.lt.s32.totalorder %s264_s26, %s264_s26 }
  0x22   :  { %v93_v13 = vsel %vm92_vm10, 1, %v296_v12 }
  0x23   :  { %v94_v16 = vsel %vm89_vm6, 0, %v93_v13  ;;  %v66_v18 = vmax.f32 %v63_v6, %v65_v15  ;;  %v71_v19 = vsub.f32 %v64_v11, %v62_v14  ;;  %p271_p13 = por %p270_p12, %p269_p11 }
  0x24   :  { %vm95_vm11 = vcmp.eq.s32.totalorder %v94_v16, %v60_v1 }
  0x25   :  { %v198_v20 = vsel %vm95_vm11, 1.0, %v294_v0  ;;  %v67_v22 = vsub.f32 %v66_v18, %v62_v14  ;;  %v72_v23 = vmul.f32 1.442695, %v71_v19  ;;  %p272_p0 = pnand %p271_p13, %p265_p10 }
  0x26   :  { %147 = vadd.xlane.f32.xlu1 %v198_v20  ;;  %v112_v21 = vmul.f32 %v199_v17, %v198_v20 }
  0x27   :  { %v68_v24 = vmul.f32 1.442695, %v67_v22  ;;  %218 = vpow2.f32 %v72_v23 }
  0x29   :  { %220 = vpow2.f32 %v68_v24 }
  0x2a   :  { %159 = vadd.xlane.f32.xlu1 %v112_v21 }
  0x34   :  { %v219_v25 = vpop.eup %218 }
  0x36   :  { %v221_v26 = vpop.eup %220 }
  0x37   :  { %v70_v27 = vadd.f32 1.0, %v221_v26 }
  0x39   :  { %v74_v28 = vadd.f32 %v219_v25, %v70_v27 }
  0x3b   :  { %222 = vlog2.f32 %v74_v28 }
  0x48   :  { %v223_v30 = vpop.eup %222 }
  0x49   :  { %v76_v31 = vmul.f32 0.6931472, %v223_v30 }
  0x4b   :  { %v77_v33 = vadd.f32 %v76_v31, %v62_v14 }
  0x4d   :  { %v86_v34 = vsub.f32 %v77_v33, %v82_v32 }
  0x4f   :  { %v102_v35 = vmul.f32 %v86_v34, %v85_v9 }
  0x51   :  { %123 = vadd.xlane.f32.xlu0 %v102_v35 }
  0x55   :  { %171 = vadd.xlane.f32.xlu0 %v199_v17 }
  0xaa   :  { %v136_v37 = vpop.xlane.xlu0 %135 }
  0xab   :  { %v137_v39 = vrot.slane %v136_v37, 4 }
  0xad   :  { %v138_v42 = vadd.f32 %v137_v39, %v136_v37 }
  0xaf   :  { %v148_v36 = vpop.xlane.xlu1 %147  ;;  %v139_v45 = vrot.slane %v138_v42, 2 }
  0xb0   :  { %v149_v40 = vrot.slane %v148_v36, 4 }
  0xb1   :  { %v140_v52 = vadd.f32 %v139_v45, %v138_v42 }
  0xb2   :  { %v150_v43 = vadd.f32 %v149_v40, %v148_v36 }
  0xb3   :  { %v160_v38 = vpop.xlane.xlu1 %159  ;;  %v141_v59 = vrot.slane %v140_v52, 1 }
  0xb4   :  { %v161_v41 = vrot.slane %v160_v38, 4  ;;  %v151_v47 = vrot.slane %v150_v43, 2 }
  0xb5   :  { %v142_v2 = vadd.f32 %v141_v59, %v140_v52 }
  0xb6   :  { %v162_v44 = vadd.f32 %v161_v41, %v160_v38  ;;  %v152_v55 = vadd.f32 %v151_v47, %v150_v43 }
  0xb8   :  { %v163_v49 = vrot.slane %v162_v44, 2  ;;  %v153_v62 = vrot.slane %v152_v55, 1 }
  0xba   :  { %v164_v56 = vadd.f32 %v163_v49, %v162_v44  ;;  %v154_v3 = vadd.f32 %v153_v62, %v152_v55 }
  0xbc   :  { %v165_v63 = vrot.slane %v164_v56, 1 }
  0xbe   :  { %v166_v5 = vadd.f32 %v165_v63, %v164_v56 }
  0xda   :  { %v124_v46 = vpop.xlane.xlu0 %123 }
  0xdb   :  { %v125_v48 = vrot.slane %v124_v46, 4 }
  0xdd   :  { %v126_v50 = vadd.f32 %v125_v48, %v124_v46 }
  0xde   :  { %v172_v51 = vpop.xlane.xlu0 %171 }
  0xdf   :  { %v127_v53 = vrot.slane %v126_v50, 2  ;;  %v173_v54 = vrot.slane %v172_v51, 4 }
  0xe1   :  { %v174_v57 = vadd.f32 %v173_v54, %v172_v51  ;;  %v128_v58 = vadd.f32 %v127_v53, %v126_v50 }
  0xe3   :  { %v175_v60 = vrot.slane %v174_v57, 2  ;;  %v129_v61 = vrot.slane %v128_v58, 1 }
  0xe5   :  { %v176_v0 = vadd.f32 %v175_v60, %v174_v57  ;;  %v130_v1 = vadd.f32 %v129_v61, %v128_v58 }
  0xe7   :  { %200 = vpush %v130_v1  ;;  %v177_v4 = vrot.slane %v176_v0, 1 }
  0xe8   :  { %202 = vpush %v142_v2 }
  0xe9   :  { %204 = vpush %v154_v3  ;;  %v178_v6 = vadd.f32 %v177_v4, %v176_v0 }
  0xea   :  { %206 = vpush %v166_v5 }
  0xeb   :  { %208 = vpush %v178_v6 }
 0x118   :  { %s201_s0 = spop %200 }
 0x119   :  { %v132_v7 = vstv %s201_s0  ;;  %s203_s1 = spop %202 }
 0x11a   :  { %133 = vst [vmem:[#allocation12] sm:$0x1] %v132_v7  ;;  %v144_v8 = vstv %s203_s1  ;;  %s205_s23 = spop %204 }
 0x11b   :  { %145 = vst [vmem:[#allocation12 + $0x1] sm:$0x1] %v144_v8  ;;  %v156_v9 = vstv %s205_s23  ;;  %s207_s24 = spop %206 }
 0x11c   :  { %157 = vst [vmem:[#allocation12 + $0x2] sm:$0x1] %v156_v9  ;;  %v168_v10 = vstv %s207_s24  ;;  %s209_s25 = spop %208 }
 0x11d   :  { %169 = vst [vmem:[#allocation12 + $0x3] sm:$0x1] %v168_v10  ;;  %v180_v11 = vstv %s209_s25 }
 0x11e   :  { %181 = vst [vmem:[#allocation12 + $0x4] sm:$0x1] %v180_v11 }
 0x11f   :  { %275 = shalt.err (!%p272_p0)
}
 0x120   :  { %191 = dma.vmem_to_hbm [thread:$0]  %s189_s22, 128, %s335_s2, [#allocation9]  }
 0x121   :  { %288 = dma.done.wait [#allocation9], 128  }
 0x122   :  { %289 = vsyncadd [#allocation9], 4294967168 }
 0x123   :  { %195 = vsyncpa [#allocation8], 1 }
 0x124   :  { %196 = vsyncpa [#allocation11], 1 }
 0x125   :  { %197 = vsyncpa [#allocation9], 1 }

</bundles_post_ra>
